<compile_context>
chip_gen: v5e
topology: v5e:2x2
jax: 0.10.0
libtpu: 0.0.40
codegen_flags: <defaults>
</compile_context>

<pallas_src>
import functools

import jax
import jax.numpy as jnp
from jax import lax
from jax.experimental import pallas as pl
from jax.experimental.pallas import tpu as pltpu


def _round_up(x, m):
    return ((x + m - 1) // m) * m


def _pad_size(s):
    """Lane/MXU padding for the hidden dim: 128 floor, 256-aligned above
    (v6e/v7x MXU is 2x 256x256; v5e's 4x 128x128 is fine either way)."""
    if s <= 128:
        return 128
    return _round_up(s, 256)


def _vmem_capacity_bytes():
    """Physical VMEM per TensorCore (64 MiB on v7x, 128 MiB on v5e/v6e)."""
    try:
        cap = int(pltpu.get_tpu_info().vmem_capacity_bytes)
        if cap > 0:
            return cap
    except Exception:
        pass
    return 64 << 20  # conservative default (v7x per-TC VMEM)


def _pick_tile_b(b_pad_min):
    """Batch tile: multiple of 128, target 256-512 rows (hides weight DMA /
    amortizes per-step overhead), and >= 2 tiles for v7x megacore when the
    batch is large enough to split."""
    if b_pad_min <= 256:
        return b_pad_min
    tile = min(512, _round_up(b_pad_min // 2, 128))
    return max(256, tile)


# ---------------------------------------------------------------------------
# Kernels
# ---------------------------------------------------------------------------
def mlp_resident_kernel(x_ref, w_ref, b_ref, o_ref, h_ref, *, num_layers):
    """Whole weight stack resident in VMEM; fori_loop over layers.

    x_ref: (tile_b, S) bf16   w_ref: (L, S, S) bf16   b_ref: (L, 1, S) f32
    o_ref: (tile_b, S) out    h_ref: (tile_b, S) bf16 scratch
    """
    # Layer 0 feeds directly from the bf16 input tile (no scratch round trip).
    out0 = jnp.dot(x_ref[...], w_ref[0],
                   preferred_element_type=jnp.float32) + b_ref[0]
    if num_layers == 1:
        o_ref[...] = out0.astype(o_ref.dtype)
        return
    h_ref[...] = jnp.maximum(out0, 0.0).astype(h_ref.dtype)

    if num_layers > 2:
        def body(l, carry):
            hw = jnp.dot(h_ref[...], w_ref[l],
                         preferred_element_type=jnp.float32) + b_ref[l]
            h_ref[...] = jnp.maximum(hw, 0.0).astype(h_ref.dtype)
            return carry

        lax.fori_loop(1, num_layers - 1, body, 0, unroll=num_layers <= 9)

    out_last = jnp.dot(h_ref[...], w_ref[num_layers - 1],
                       preferred_element_type=jnp.float32) + b_ref[num_layers - 1]
    o_ref[...] = out_last.astype(o_ref.dtype)


def mlp_streamed_kernel(x_ref, w_ref, b_ref, o_ref, h_ref, *, num_layers):
    """One (batch tile, layer) per grid step; layer weights streamed.

    w_ref/b_ref have their leading layer dim squeezed by the BlockSpec.
    """
    l = pl.program_id(1)

    # Layer 0: cheap bf16 copy of the input tile into the resident activation.
    @pl.when(l == 0)
    def _():
        h_ref[...] = x_ref[...]

    out = jnp.dot(h_ref[...], w_ref[...],
                  preferred_element_type=jnp.float32) + b_ref[...]

    @pl.when(l < num_layers - 1)
    def _():
        h_ref[...] = jnp.maximum(out, 0.0).astype(h_ref.dtype)

    @pl.when(l == num_layers - 1)
    def _():
        o_ref[...] = out.astype(o_ref.dtype)


# ---------------------------------------------------------------------------
# Parameter prep + forward wrapper
# ---------------------------------------------------------------------------
def prepare_mlp_params(weights, biases, *, compute_dtype=jnp.bfloat16):
    """One-time prep (NOT per forward): transpose to (in, out) so the kernel
    computes h @ W_t + b (== x @ W.T + b), pad the hidden dim to a lane/MXU
    friendly size, cast weights to the MXU compute dtype."""
    L, S_out, S_in = weights.shape
    assert S_out == S_in, "MLP packs square (size, size) layers"
    s_pad = _pad_size(S_in)
    w_t = jnp.transpose(weights, (0, 2, 1)).astype(compute_dtype)    # (L, in, out)
    w_p = jnp.zeros((L, s_pad, s_pad), compute_dtype).at[:, :S_in, :S_out].set(w_t)
    b_p = jnp.zeros((L, 1, s_pad), jnp.float32).at[:, 0, :S_out].set(
        biases.astype(jnp.float32))
    return w_p, b_p


@functools.partial(
    jax.jit,
    static_argnames=("tile_b", "b_pad", "resident", "vmem_limit", "compute_dtype"))
def _mlp_forward_impl(x, w_p, b_p, *, tile_b, b_pad, resident, vmem_limit,
                      compute_dtype):
    B, S = x.shape
    L, s_pad, _ = w_p.shape
    out_dtype = x.dtype

    # Pad activations to a lane-dense, MXU-shaped tile (cheap, activation-sized).
    x_p = jnp.zeros((b_pad, s_pad), compute_dtype).at[:B, :S].set(
        x.astype(compute_dtype))

    if resident:
        kernel = functools.partial(mlp_resident_kernel, num_layers=L)
        out_p = pl.pallas_call(
            kernel,
            out_shape=jax.ShapeDtypeStruct((b_pad, s_pad), out_dtype),
            grid=(b_pad // tile_b,),
            in_specs=[
                pl.BlockSpec((tile_b, s_pad), lambda i: (i, 0)),       # x tile
                pl.BlockSpec((L, s_pad, s_pad), lambda i: (0, 0, 0)),  # all weights
                pl.BlockSpec((L, 1, s_pad), lambda i: (0, 0, 0)),      # all biases
            ],
            out_specs=pl.BlockSpec((tile_b, s_pad), lambda i: (i, 0)),
            scratch_shapes=[pltpu.VMEM((tile_b, s_pad), compute_dtype)],
            compiler_params=pltpu.CompilerParams(
                dimension_semantics=("parallel",),
                vmem_limit_bytes=vmem_limit),
        )(x_p, w_p, b_p)
    else:
        kernel = functools.partial(mlp_streamed_kernel, num_layers=L)
        out_p = pl.pallas_call(
            kernel,
            out_shape=jax.ShapeDtypeStruct((b_pad, s_pad), out_dtype),
            grid=(b_pad // tile_b, L),
            in_specs=[
                pl.BlockSpec((tile_b, s_pad), lambda i, l: (i, 0)),        # x tile
                pl.BlockSpec((None, s_pad, s_pad), lambda i, l: (l, 0, 0)),  # layer w
                pl.BlockSpec((None, 1, s_pad), lambda i, l: (l, 0, 0)),      # layer b
            ],
            out_specs=pl.BlockSpec((tile_b, s_pad), lambda i, l: (i, 0)),
            scratch_shapes=[pltpu.VMEM((tile_b, s_pad), compute_dtype)],
            compiler_params=pltpu.CompilerParams(
                dimension_semantics=("parallel", "arbitrary"),
                vmem_limit_bytes=vmem_limit),
        )(x_p, w_p, b_p)

    return out_p[:B, :S]


def mlp_forward(x, w_p, b_p, *, compute_dtype=jnp.bfloat16):
    """x: (B, S); w_p/b_p from prepare_mlp_params. Returns (B, S) in x.dtype."""
    B, S = x.shape
    L, s_pad, _ = w_p.shape
    cbytes = jnp.dtype(compute_dtype).itemsize
    obytes = jnp.dtype(x.dtype).itemsize

    budget = _vmem_capacity_bytes() - (8 << 20)  # ~8 MiB headroom

    b_pad_min = _round_up(max(B, 128), 128)
    tile_b = _pick_tile_b(b_pad_min)

    def act_bytes(tb):
        return (2 * tb * s_pad * cbytes     # input tile, double-buffered
                + 2 * tb * s_pad * obytes   # output tile, double-buffered
                + tb * s_pad * cbytes)      # resident bf16 activation scratch

    w_resident = 2 * L * s_pad * s_pad * cbytes + 2 * L * s_pad * 4
    w_streamed = 2 * s_pad * s_pad * cbytes + 2 * s_pad * 4

    resident = (w_resident + act_bytes(tile_b)) <= budget
    if not resident:
        # Streamed fallback: shrink the batch tile if necessary to fit VMEM.
        while tile_b > 128 and (w_streamed + act_bytes(tile_b)) > budget:
            tile_b //= 2
        # TODO(synk): for very large s_pad on v7x (>= ~4096) an output-column
        # tiling axis on the weight BlockSpec would be needed; not implemented.

    b_pad = _round_up(b_pad_min, tile_b)
    est = (w_resident if resident else w_streamed) + act_bytes(tile_b)
    vmem_limit = int(min(max(int(1.25 * est) + (4 << 20), 32 << 20), budget))

    return _mlp_forward_impl(x, w_p, b_p, tile_b=tile_b, b_pad=b_pad,
                             resident=resident, vmem_limit=vmem_limit,
                             compute_dtype=compute_dtype)


# ---------------------------------------------------------------------------
# Reference + init
# ---------------------------------------------------------------------------
def init_mlp_params(key, number_layers, size):
    """Deterministic init matching nn.Linear default U(-1/sqrt(in), 1/sqrt(in))."""
    bound = 1.0 / jnp.sqrt(jnp.asarray(size, jnp.float32))
    kw, kb = jax.random.split(key)
    weights = jax.random.uniform(
        kw, (number_layers, size, size), jnp.float32, minval=-bound, maxval=bound)
    biases = jax.random.uniform(
        kb, (number_layers, size), jnp.float32, minval=-bound, maxval=bound)
    return weights, biases


def mlp_reference(x, weights, biases, compute_dtype=jnp.float32):
    """Pure-JAX reference of the PyTorch forward pass. With compute_dtype=bf16 it
    emulates the kernel's arithmetic (bf16 operands, f32 accumulation)."""
    h = x.astype(jnp.float32)
    L = weights.shape[0]
    for l in range(L):
        hw = jnp.dot(h.astype(compute_dtype),
                     weights[l].T.astype(compute_dtype),
                     preferred_element_type=jnp.float32) + biases[l]
        h = jnp.maximum(hw, 0.0) if l < L - 1 else hw
    return h


if __name__ == "__main__":
    # Small shapes: batch=8, hidden size=32, number_layers=3
    # (=> 2 Linear+ReLU blocks followed by one final Linear).
    number_layers = 3
    batch = 8
    size = 32

    key = jax.random.PRNGKey(0)
    kx, kp = jax.random.split(key)
    x = jax.random.normal(kx, (batch, size), jnp.float32)
    weights, biases = init_mlp_params(kp, number_layers, size)

    # One-time parameter prep (transpose + pad + bf16 cast) outside forward.
    w_p, b_p = prepare_mlp_params(weights, biases, compute_dtype=jnp.bfloat16)

    out = mlp_forward(x, w_p, b_p)
    out = jax.block_until_ready(out)
    assert out.shape == (batch, size)
    assert out.dtype == x.dtype

    # Exact-arithmetic reference (same bf16 operands, f32 accumulation): tight.
    ref_bf16 = mlp_reference(x, weights, biases, compute_dtype=jnp.bfloat16)
    assert jnp.allclose(out, ref_bf16, atol=1e-4, rtol=1e-4), "mismatch vs bf16 ref"
    # Full-f32 PyTorch-equivalent reference: loose tolerance for bf16 weights.
    ref_f32 = mlp_reference(x, weights, biases, compute_dtype=jnp.float32)
    assert jnp.allclose(out, ref_f32, atol=1e-1, rtol=1e-1), "mismatch vs f32 ref"

    # TODO(synk): compute_spectral_norm_ (power-iteration Lipschitz bound) is a
    # diagnostic method, not part of forward(); not implemented as a kernel.
    print("KERNEL_OK")
</pallas_src>

<mosaic_0001>
module attributes {stable_mosaic.version = 11 : i64} {
  func.func @mlp_resident_kernel(%arg0: i32, %arg1: memref<128x128xbf16, #tpu.memory_space<vmem>>, %arg2: memref<3x128x128xbf16, #tpu.memory_space<vmem>>, %arg3: memref<3x1x128xf32, #tpu.memory_space<vmem>>, %arg4: memref<128x128xf32, #tpu.memory_space<vmem>>, %arg5: memref<128x128xbf16, #tpu.memory_space<vmem>>) attributes {dimension_semantics = [#tpu.dimension_semantics<parallel>], iteration_bounds = array<i64: 1>, scalar_prefetch = 0 : i64, scratch_operands = 1 : i64, tpu.core_type = #tpu.core_type<tc>, window_params = [{transform_indices = @transform_0, window_bounds = array<i64: 128, 128>}, {pipeline_mode = #tpu.pipeline_mode<synchronous>, transform_indices = @transform_1, window_bounds = array<i64: 3, 128, 128>}, {pipeline_mode = #tpu.pipeline_mode<synchronous>, transform_indices = @transform_2, window_bounds = array<i64: 3, 1, 128>}, {transform_indices = @transform_3, window_bounds = array<i64: 128, 128>}]} {
    %c0 = arith.constant 0 : index
    %c0_0 = arith.constant 0 : index
    %0 = vector.load %arg1[%c0, %c0_0] : memref<128x128xbf16, #tpu.memory_space<vmem>>, vector<128x128xbf16>
    %c0_1 = arith.constant 0 : index
    %c0_2 = arith.constant 0 : index
    %c0_3 = arith.constant 0 : index
    %1 = vector.load %arg2[%c0_1, %c0_2, %c0_3] : memref<3x128x128xbf16, #tpu.memory_space<vmem>>, vector<1x128x128xbf16>
    %2 = vector.shape_cast %1 : vector<1x128x128xbf16> to vector<128x128xbf16>
    %cst = arith.constant dense<0.000000e+00> : vector<128x128xf32>
    %3 = tpu.matmul %0, %2, %cst {dimension_numbers = #tpu.dot_dimension_numbers<[1], [0], [0], [1], [0, 0, 1, 1], [], []>} : vector<128x128xbf16>, vector<128x128xbf16>, vector<128x128xf32> -> vector<128x128xf32>
    %c0_4 = arith.constant 0 : index
    %c0_5 = arith.constant 0 : index
    %c0_6 = arith.constant 0 : index
    %4 = vector.load %arg3[%c0_4, %c0_5, %c0_6] : memref<3x1x128xf32, #tpu.memory_space<vmem>>, vector<1x1x128xf32>
    %5 = vector.shape_cast %4 : vector<1x1x128xf32> to vector<1x128xf32>
    %6 = vector.broadcast %5 : vector<1x128xf32> to vector<128x128xf32>
    %7 = arith.addf %3, %6 : vector<128x128xf32>
    %cst_7 = arith.constant 0.000000e+00 : f32
    %8 = vector.broadcast %cst_7 : f32 to vector<128x128xf32>
    %9 = arith.maximumf %7, %8 : vector<128x128xf32>
    %10 = arith.truncf %9 : vector<128x128xf32> to vector<128x128xbf16>
    %c0_8 = arith.constant 0 : index
    %c0_9 = arith.constant 0 : index
    %11 = vector.load %arg5[%c0_8, %c0_9] : memref<128x128xbf16, #tpu.memory_space<vmem>>, vector<128x128xbf16>
    tpu.vector_store %arg5[%c0_8, %c0_9], %10 {strides = array<i32>} : memref<128x128xbf16, #tpu.memory_space<vmem>>, vector<128x128xbf16>,
    %c1_i32 = arith.constant 1 : i32
    %c0_10 = arith.constant 0 : index
    %c0_11 = arith.constant 0 : index
    %12 = vector.load %arg5[%c0_10, %c0_11] : memref<128x128xbf16, #tpu.memory_space<vmem>>, vector<128x128xbf16>
    %13 = arith.index_cast %c1_i32 : i32 to index
    %c0_12 = arith.constant 0 : index
    %c0_13 = arith.constant 0 : index
    %14 = vector.load %arg2[%13, %c0_12, %c0_13] : memref<3x128x128xbf16, #tpu.memory_space<vmem>>, vector<1x128x128xbf16>
    %15 = vector.shape_cast %14 : vector<1x128x128xbf16> to vector<128x128xbf16>
    %cst_14 = arith.constant dense<0.000000e+00> : vector<128x128xf32>
    %16 = tpu.matmul %12, %15, %cst_14 {dimension_numbers = #tpu.dot_dimension_numbers<[1], [0], [0], [1], [0, 0, 1, 1], [], []>} : vector<128x128xbf16>, vector<128x128xbf16>, vector<128x128xf32> -> vector<128x128xf32>
    %17 = arith.index_cast %c1_i32 : i32 to index
    %c0_15 = arith.constant 0 : index
    %c0_16 = arith.constant 0 : index
    %18 = vector.load %arg3[%17, %c0_15, %c0_16] : memref<3x1x128xf32, #tpu.memory_space<vmem>>, vector<1x1x128xf32>
    %19 = vector.shape_cast %18 : vector<1x1x128xf32> to vector<1x128xf32>
    %20 = vector.broadcast %19 : vector<1x128xf32> to vector<128x128xf32>
    %21 = arith.addf %16, %20 : vector<128x128xf32>
    %cst_17 = arith.constant 0.000000e+00 : f32
    %22 = vector.broadcast %cst_17 : f32 to vector<128x128xf32>
    %23 = arith.maximumf %21, %22 : vector<128x128xf32>
    %24 = arith.truncf %23 : vector<128x128xf32> to vector<128x128xbf16>
    %c0_18 = arith.constant 0 : index
    %c0_19 = arith.constant 0 : index
    %25 = vector.load %arg5[%c0_18, %c0_19] : memref<128x128xbf16, #tpu.memory_space<vmem>>, vector<128x128xbf16>
    tpu.vector_store %arg5[%c0_18, %c0_19], %24 {strides = array<i32>} : memref<128x128xbf16, #tpu.memory_space<vmem>>, vector<128x128xbf16>,
    %c1_i32_20 = arith.constant 1 : i32
    %c0_21 = arith.constant 0 : index
    %c0_22 = arith.constant 0 : index
    %26 = vector.load %arg5[%c0_21, %c0_22] : memref<128x128xbf16, #tpu.memory_space<vmem>>, vector<128x128xbf16>
    %c2 = arith.constant 2 : index
    %c0_23 = arith.constant 0 : index
    %c0_24 = arith.constant 0 : index
    %27 = vector.load %arg2[%c2, %c0_23, %c0_24] : memref<3x128x128xbf16, #tpu.memory_space<vmem>>, vector<1x128x128xbf16>
    %28 = vector.shape_cast %27 : vector<1x128x128xbf16> to vector<128x128xbf16>
    %cst_25 = arith.constant dense<0.000000e+00> : vector<128x128xf32>
    %29 = tpu.matmul %26, %28, %cst_25 {dimension_numbers = #tpu.dot_dimension_numbers<[1], [0], [0], [1], [0, 0, 1, 1], [], []>} : vector<128x128xbf16>, vector<128x128xbf16>, vector<128x128xf32> -> vector<128x128xf32>
    %c2_26 = arith.constant 2 : index
    %c0_27 = arith.constant 0 : index
    %c0_28 = arith.constant 0 : index
    %30 = vector.load %arg3[%c2_26, %c0_27, %c0_28] : memref<3x1x128xf32, #tpu.memory_space<vmem>>, vector<1x1x128xf32>
    %31 = vector.shape_cast %30 : vector<1x1x128xf32> to vector<1x128xf32>
    %32 = vector.broadcast %31 : vector<1x128xf32> to vector<128x128xf32>
    %33 = arith.addf %29, %32 : vector<128x128xf32>
    %c0_29 = arith.constant 0 : index
    %c0_30 = arith.constant 0 : index
    %34 = vector.load %arg4[%c0_29, %c0_30] : memref<128x128xf32, #tpu.memory_space<vmem>>, vector<128x128xf32>
    tpu.vector_store %arg4[%c0_29, %c0_30], %33 {strides = array<i32>} : memref<128x128xf32, #tpu.memory_space<vmem>>, vector<128x128xf32>,
    return
  }
  func.func @transform_0(%arg0: i32) -> (i32, i32) {
    %c0_i32 = arith.constant 0 : i32
    %c0_i32_0 = arith.constant 0 : i32
    return %arg0, %c0_i32 : i32, i32
  }
  func.func @transform_1(%arg0: i32) -> (i32, i32, i32) {
    %c0_i32 = arith.constant 0 : i32
    %c0_i32_0 = arith.constant 0 : i32
    %c0_i32_1 = arith.constant 0 : i32
    %c0_i32_2 = arith.constant 0 : i32
    return %c0_i32, %c0_i32_0, %c0_i32_1 : i32, i32, i32
  }
  func.func @transform_2(%arg0: i32) -> (i32, i32, i32) {
    %c0_i32 = arith.constant 0 : i32
    %c0_i32_0 = arith.constant 0 : i32
    %c0_i32_1 = arith.constant 0 : i32
    %c0_i32_2 = arith.constant 0 : i32
    return %c0_i32, %c0_i32_0, %c0_i32_1 : i32, i32, i32
  }
  func.func @transform_3(%arg0: i32) -> (i32, i32) {
    %c0_i32 = arith.constant 0 : i32
    %c0_i32_0 = arith.constant 0 : i32
    return %arg0, %c0_i32 : i32, i32
  }
}

</mosaic_0001>

<bundles_post_ra>
// kernel: _mlp_forward_impl.1
= control target key start
LH: loop header
LB: loop body
LE: loop exit
PB: predicated region body
PF: predicated region fallthrough
CT: control target
= control target key end

     0   :  { %8 = vsyncpa [#allocation4], 0  ;;  %s1086_s15 = smov [#allocation3]   ;;  %s1087_s17 = smov 64   ;;  %s1229_s0 = inlined_call_operand.vmem [shape: bf16[128,128], index: 0, kind: input, shape index: {}]   ;;  %s1230_s1 = inlined_call_operand.hbm [shape: bf16[3,128,128], index: 1, kind: input, shape index: {}]   ;;  %s1231_s2 = inlined_call_operand.vmem [shape: f32[3,1,128], index: 2, kind: input, shape index: {}]   ;;  %s1232_s3 = inlined_call_operand.vmem [shape: f32[128,128], index: 3, kind: output, shape index: {}]  }
   0x1   :  { %s15_s14 = sshll.u32 %s1230_s1, 4  ;;  %s17_s16 = sshll.u32 %s1086_s15, 4  ;;  %s16_s14 = int_to_ptr.hbm [resolvable:$true] %s15_s14  ;;  %s18_s16 = int_to_ptr.vmem [resolvable:$true] %s17_s16 }
   0x2   :  { %s1088_s18 = smov 4  }
   0x3   :  { %23 = dma.hbm_to_vmem [thread:$0]  %s16_s14, 3072, %s18_s16, [#allocation4], %s1087_s17, %s1087_s17, %s1088_s18  }
   0x4   :  { %1084 = dma.done.wait [#allocation4], 3072  }
   0x5   :  { %1085 = vsyncadd [#allocation4], 4294964224  ;;  %v903_v0 = vld [vmem:[#allocation3 + $0x38] sm:$0xff]  ;;  %v902_v1 = vld [vmem:[#allocation3 + $0x30] sm:$0xff] }
   0x6   :  { %162 = vmatpush.bf16.msra.mxu0 %v903_v0  ;;  %1030 = vmatpush.bf16.msra.mxu3 %v903_v0  ;;  %v901_v2 = vld [vmem:[#allocation3 + $0x28] sm:$0xff]  ;;  %v900_v3 = vld [vmem:[#allocation3 + $0x20] sm:$0xff]  ;;  %v899_v4 = vld [vmem:[#allocation3 + $0x18] sm:$0xff] }
   0x7   :  { %v898_v5 = vld [vmem:[#allocation3 + $0x10] sm:$0xff]  ;;  %v897_v6 = vld [vmem:[#allocation3 + $0x8] sm:$0xff]  ;;  %v896_v7 = vld [vmem:[#allocation3] sm:$0xff] }
   0x8   :  { %v888_v8 = vld [vmem:[%s1229_s0] sm:$0xff]  ;;  %v894_v9 = vld [vmem:[%s1229_s0 + $0x30] sm:$0xff]  ;;  %v889_v10 = vld [vmem:[%s1229_s0 + $0x8] sm:$0xff] }
   0x9   :  { %v895_v11 = vld [vmem:[%s1229_s0 + $0x38] sm:$0xff]  ;;  %v890_v12 = vld [vmem:[%s1229_s0 + $0x10] sm:$0xff]  ;;  %v892_v16 = vld [vmem:[%s1229_s0 + $0x20] sm:$0xff] }
   0xa   :  { %163 = vmatpush.bf16.msra.mxu0 %v902_v1  ;;  %1031 = vmatpush.bf16.msra.mxu3 %v902_v1  ;;  %v891_v13 = vld [vmem:[%s1229_s0 + $0x18] sm:$0xff]  ;;  %v918_v15 = vld [vmem:[#allocation3 + $0x70] sm:$0xff]  ;;  %v893_v17 = vld [vmem:[%s1229_s0 + $0x28] sm:$0xff] }
   0xb   :  { %v919_v14 = vld [vmem:[#allocation3 + $0x78] sm:$0xff]  ;;  %v917_v18 = vld [vmem:[#allocation3 + $0x68] sm:$0xff]  ;;  %v916_v19 = vld [vmem:[#allocation3 + $0x60] sm:$0xff] }
   0xc   :  { %393 = vmatpush.bf16.msra.mxu1 %v919_v14  ;;  %v915_v20 = vld [vmem:[#allocation3 + $0x58] sm:$0xff]  ;;  %v914_v21 = vld [vmem:[#allocation3 + $0x50] sm:$0xff]  ;;  %v913_v22 = vld [vmem:[#allocation3 + $0x48] sm:$0xff] }
   0xd   :  { %v912_v23 = vld [vmem:[#allocation3 + $0x40] sm:$0xff] }
   0xe   :  { %164 = vmatpush.bf16.msra.mxu0 %v901_v2  ;;  %1032 = vmatpush.bf16.msra.mxu3 %v901_v2  ;;  %v1139_v25 = vld [vmem:[%s1231_s2] ss:$0 sm:$0xff] }
  0x10   :  { %394 = vmatpush.bf16.msra.mxu1 %v918_v15 }
  0x12   :  { %165 = vmatpush.bf16.msra.mxu0 %v900_v3  ;;  %1033 = vmatpush.bf16.msra.mxu3 %v900_v3 }
  0x14   :  { %395 = vmatpush.bf16.msra.mxu1 %v917_v18 }
  0x16   :  { %166 = vmatpush.bf16.msra.mxu0 %v899_v4  ;;  %1034 = vmatpush.bf16.msra.mxu3 %v899_v4 }
  0x18   :  { %396 = vmatpush.bf16.msra.mxu1 %v916_v19 }
  0x1a   :  { %167 = vmatpush.bf16.msra.mxu0 %v898_v5  ;;  %1035 = vmatpush.bf16.msra.mxu3 %v898_v5 }
  0x1c   :  { %397 = vmatpush.bf16.msra.mxu1 %v915_v20 }
  0x1e   :  { %168 = vmatpush.bf16.msra.mxu0 %v897_v6  ;;  %1036 = vmatpush.bf16.msra.mxu3 %v897_v6 }
  0x20   :  { %398 = vmatpush.bf16.msra.mxu1 %v914_v21 }
  0x22   :  { %169 = vmatpush.bf16.msra.mxu0 %v896_v7  ;;  %1037 = vmatpush.bf16.msra.mxu3 %v896_v7 }
  0x24   :  { %399 = vmatpush.bf16.msra.mxu1 %v913_v22 }
  0x25   :  { %170 = vmatmul.bf16.vlgmr.msra.gmra.mxu0 %v888_v8  ;;  %200 = vmatmul.bf16.vlgmr.msra.gmra.mxu3 %v894_v9 }
  0x26   :  { %1038 = vmatpush.bf16.msrb.mxu3 %v919_v14  ;;  %v934_v14 = vld [vmem:[#allocation3 + $0xb0] sm:$0xff] }
  0x28   :  { %400 = vmatpush.bf16.msra.mxu1 %v912_v23 }
  0x2a   :  { %1039 = vmatpush.bf16.msrb.mxu3 %v918_v15 }
  0x2e   :  { %1040 = vmatpush.bf16.msrb.mxu3 %v917_v18 }
  0x32   :  { %1041 = vmatpush.bf16.msrb.mxu3 %v916_v19 }
  0x35   :  { %175 = vmatmul.bf16.gmra.mxu0 %v889_v10  ;;  %205 = vmatmul.bf16.gmra.mxu3 %v895_v11 }
  0x36   :  { %1042 = vmatpush.bf16.msrb.mxu3 %v915_v20 }
  0x3a   :  { %1043 = vmatpush.bf16.msrb.mxu3 %v914_v21 }
  0x3e   :  { %1044 = vmatpush.bf16.msrb.mxu3 %v913_v22 }
  0x42   :  { %1045 = vmatpush.bf16.msrb.mxu3 %v912_v23 }
  0x45   :  { %180 = vmatmul.bf16.gmra.mxu0 %v890_v12  ;;  %v935_v12 = vld [vmem:[#allocation3 + $0xb8] sm:$0xff] }
  0x46   :  { %624 = vmatpush.bf16.msra.mxu2 %v935_v12  ;;  %1046 = vmatpush.bf16.msra.mxu3 %v935_v12 }
  0x4a   :  { %625 = vmatpush.bf16.msra.mxu2 %v934_v14  ;;  %1047 = vmatpush.bf16.msra.mxu3 %v934_v14 }
  0x55   :  { %185 = vmatmul.bf16.gmra.mxu0 %v891_v13 }
  0x65   :  { %190 = vmatmul.bf16.gmra.mxu0 %v892_v16 }
  0x75   :  { %195 = vmatmul.bf16.gmra.mxu0 %v893_v17 }
  0xa2   :  { %v171_v24 = vpop.f32.mrf.mxu0 }
  0xa3   :  { %v172_v27 = vadd.f32 %v1139_v25, %v171_v24 }
  0xa5   :  { %v211_v30 = vmax.f32 %v172_v27, 0.0 }
  0xa8   :  { %v201_v26 = vpop.f32.mrf.mxu3 }
  0xa9   :  { %v202_v32 = vadd.f32 %v1139_v25, %v201_v26 }
  0xaa   :  { %v173_v28 = vpop.f32.mrf.mxu0 }
  0xab   :  { %v174_v29 = vadd.f32 %v1139_v25, %v173_v28  ;;  %v223_v35 = vmax.f32 %v202_v32, 0.0  ;;  %v933_v28 = vld [vmem:[#allocation3 + $0xa8] sm:$0xff] }
  0xac   :  { %626 = vmatpush.bf16.msra.mxu2 %v933_v28  ;;  %1048 = vmatpush.bf16.msra.mxu3 %v933_v28  ;;  %v929_v32 = vld [vmem:[#allocation3 + $0x88] sm:$0xff] }
  0xad   :  { %v212_v31 = vmax.f32 %v174_v29, 0.0  ;;  %v932_v29 = vld [vmem:[#allocation3 + $0xa0] sm:$0xff] }
  0xaf   :  { %v939_v33 = vpack.c.bf16 %v212_v31, %v211_v30  ;;  %v931_v30 = vld [vmem:[#allocation3 + $0x98] sm:$0xff]  ;;  %v930_v31 = vld [vmem:[#allocation3 + $0x90] sm:$0xff] }
  0xb0   :  { %v203_v34 = vpop.f32.mrf.mxu3  ;;  %627 = vmatpush.bf16.msra.mxu2 %v932_v29  ;;  %1049 = vmatpush.bf16.msra.mxu3 %v932_v29 }
  0xb1   :  { %940 = vst [vmem:[#allocation2 + $0x30] sm:$0xff] %v939_v33   ;;  %v204_v36 = vadd.f32 %v1139_v25, %v203_v34  ;;  %v1160_v34 = vld [vmem:[%s1231_s2 + $0x1] ss:$0 sm:$0xff] }
  0xb2   :  { %v176_v37 = vpop.f32.mrf.mxu0 }
  0xb3   :  { %v224_v38 = vmax.f32 %v204_v36, 0.0  ;;  %v177_v42 = vadd.f32 %v1139_v25, %v176_v37 }
  0xb4   :  { %628 = vmatpush.bf16.msra.mxu2 %v931_v30  ;;  %1050 = vmatpush.bf16.msra.mxu3 %v931_v30 }
  0xb5   :  { %v969_v39 = vpack.c.bf16 %v224_v38, %v223_v35  ;;  %v213_v45 = vmax.f32 %v177_v42, 0.0 }
  0xb7   :  { %1021 = vst [vmem:[#allocation2 + $0x28] sm:$0xff] %v969_v39  }
  0xb8   :  { %v904_v40 = vld [vmem:[#allocation2 + $0x30] sm:$0xff]  ;;  %v206_v41 = vpop.f32.mrf.mxu3  ;;  %629 = vmatpush.bf16.msra.mxu2 %v930_v31  ;;  %1051 = vmatpush.bf16.msra.mxu3 %v930_v31 }
  0xb9   :  { %401 = vmatmul.bf16.vlgmr.msra.gmra.mxu1 %v904_v40  ;;  %v207_v47 = vadd.f32 %v1139_v25, %v206_v41 }
  0xba   :  { %v178_v43 = vpop.f32.mrf.mxu0 }
  0xbb   :  { %v179_v44 = vadd.f32 %v1139_v25, %v178_v43  ;;  %v225_v51 = vmax.f32 %v207_v47, 0.0 }
  0xbc   :  { %630 = vmatpush.bf16.msra.mxu2 %v929_v32  ;;  %1052 = vmatpush.bf16.msra.mxu3 %v929_v32 }
  0xbd   :  { %v214_v46 = vmax.f32 %v179_v44, 0.0 }
  0xbe   :  { %v910_v48 = vld [vmem:[#allocation2 + $0x28] sm:$0xff] }
  0xbf   :  { %v944_v49 = vpack.c.bf16 %v214_v46, %v213_v45  ;;  %431 = vmatmul.bf16.vlgmr.msrb.gmra.mxu3 %v910_v48 }
  0xc0   :  { %v208_v50 = vpop.f32.mrf.mxu3 }
  0xc1   :  { %1016 = vst [vmem:[#allocation2] sm:$0xff] %v944_v49   ;;  %v209_v52 = vadd.f32 %v1139_v25, %v208_v50 }
  0xc2   :  { %v181_v53 = vpop.f32.mrf.mxu0 }
  0xc3   :  { %v226_v54 = vmax.f32 %v209_v52, 0.0  ;;  %v182_v57 = vadd.f32 %v1139_v25, %v181_v53 }
  0xc5   :  { %v974_v55 = vpack.c.bf16 %v226_v54, %v225_v51  ;;  %v215_v60 = vmax.f32 %v182_v57, 0.0 }
  0xc7   :  { %1022 = vst [vmem:[#allocation2 + $0x38] sm:$0xff] %v974_v55  }
  0xc8   :  { %v905_v56 = vld [vmem:[#allocation2] sm:$0xff] }
  0xc9   :  { %406 = vmatmul.bf16.gmra.mxu1 %v905_v56 }
  0xca   :  { %v183_v58 = vpop.f32.mrf.mxu0 }
  0xcb   :  { %v184_v59 = vadd.f32 %v1139_v25, %v183_v58 }
  0xcd   :  { %v216_v61 = vmax.f32 %v184_v59, 0.0 }
  0xce   :  { %v911_v62 = vld [vmem:[#allocation2 + $0x38] sm:$0xff] }
  0xcf   :  { %v949_v63 = vpack.c.bf16 %v216_v61, %v215_v60  ;;  %436 = vmatmul.bf16.gmra.mxu3 %v911_v62 }
  0xd1   :  { %1017 = vst [vmem:[#allocation2 + $0x18] sm:$0xff] %v949_v63  }
  0xd2   :  { %v186_v0 = vpop.f32.mrf.mxu0 }
  0xd3   :  { %v187_v2 = vadd.f32 %v1139_v25, %v186_v0 }
  0xd5   :  { %v217_v5 = vmax.f32 %v187_v2, 0.0 }
  0xd8   :  { %v906_v1 = vld [vmem:[#allocation2 + $0x18] sm:$0xff] }
  0xd9   :  { %411 = vmatmul.bf16.gmra.mxu1 %v906_v1 }
  0xda   :  { %v188_v3 = vpop.f32.mrf.mxu0 }
  0xdb   :  { %v189_v4 = vadd.f32 %v1139_v25, %v188_v3 }
  0xdd   :  { %v218_v6 = vmax.f32 %v189_v4, 0.0 }
  0xdf   :  { %v954_v7 = vpack.c.bf16 %v218_v6, %v217_v5 }
  0xe1   :  { %1018 = vst [vmem:[#allocation2 + $0x10] sm:$0xff] %v954_v7  }
  0xe2   :  { %v191_v8 = vpop.f32.mrf.mxu0 }
  0xe3   :  { %v192_v10 = vadd.f32 %v1139_v25, %v191_v8 }
  0xe5   :  { %v219_v15 = vmax.f32 %v192_v10, 0.0 }
  0xe8   :  { %v907_v9 = vld [vmem:[#allocation2 + $0x10] sm:$0xff] }
  0xe9   :  { %416 = vmatmul.bf16.gmra.mxu1 %v907_v9 }
  0xea   :  { %v193_v11 = vpop.f32.mrf.mxu0 }
  0xeb   :  { %v194_v13 = vadd.f32 %v1139_v25, %v193_v11 }
  0xed   :  { %v220_v16 = vmax.f32 %v194_v13, 0.0 }
  0xef   :  { %v959_v17 = vpack.c.bf16 %v220_v16, %v219_v15 }
  0xf1   :  { %1019 = vst [vmem:[#allocation2 + $0x8] sm:$0xff] %v959_v17  }
  0xf2   :  { %v196_v18 = vpop.f32.mrf.mxu0 }
  0xf3   :  { %v197_v20 = vadd.f32 %v1139_v25, %v196_v18 }
  0xf5   :  { %v221_v23 = vmax.f32 %v197_v20, 0.0 }
  0xf8   :  { %v908_v19 = vld [vmem:[#allocation2 + $0x8] sm:$0xff] }
  0xf9   :  { %421 = vmatmul.bf16.gmra.mxu1 %v908_v19 }
  0xfa   :  { %v198_v21 = vpop.f32.mrf.mxu0 }
  0xfb   :  { %v199_v22 = vadd.f32 %v1139_v25, %v198_v21  ;;  %v928_v25 = vld [vmem:[#allocation3 + $0x80] sm:$0xff] }
  0xfc   :  { %631 = vmatpush.bf16.msra.mxu2 %v928_v25  ;;  %1053 = vmatpush.bf16.msra.mxu3 %v928_v25 }
  0xfd   :  { %v222_v24 = vmax.f32 %v199_v22, 0.0 }
  0xff   :  { %v964_v26 = vpack.c.bf16 %v222_v24, %v221_v23 }
 0x101   :  { %1020 = vst [vmem:[#allocation2 + $0x20] sm:$0xff] %v964_v26  }
 0x108   :  { %v909_v27 = vld [vmem:[#allocation2 + $0x20] sm:$0xff] }
 0x109   :  { %426 = vmatmul.bf16.gmra.mxu1 %v909_v27 }
 0x136   :  { %v402_v33 = vpop.f32.mrf.mxu1 }
 0x137   :  { %v403_v35 = vadd.f32 %v1160_v34, %v402_v33 }
 0x139   :  { %v442_v38 = vmax.f32 %v403_v35, 0.0  ;;  %v1059_v35 = vld [vmem:[%s1231_s2 + $0x2] ss:$0 sm:$0xff] }
 0x13e   :  { %v404_v36 = vpop.f32.mrf.mxu1 }
 0x13f   :  { %v405_v37 = vadd.f32 %v1160_v34, %v404_v36 }
 0x141   :  { %v443_v39 = vmax.f32 %v405_v37, 0.0 }
 0x142   :  { %v432_v40 = vpop.f32.mrf.mxu3 }
 0x143   :  { %v979_v41 = vpack.c.bf16 %v443_v39, %v442_v38  ;;  %v433_v43 = vadd.f32 %v1160_v34, %v432_v40 }
 0x145   :  { %980 = vst [vmem:[#allocation2 + $0x30] sm:$0xff] %v979_v41   ;;  %v454_v45 = vmax.f32 %v433_v43, 0.0 }
 0x146   :  { %v407_v42 = vpop.f32.mrf.mxu1 }
 0x147   :  { %v408_v48 = vadd.f32 %v1160_v34, %v407_v42 }
 0x149   :  { %v444_v53 = vmax.f32 %v408_v48, 0.0 }
 0x14a   :  { %v434_v44 = vpop.f32.mrf.mxu3 }
 0x14b   :  { %v435_v46 = vadd.f32 %v1160_v34, %v434_v44 }
 0x14c   :  { %v920_v47 = vld [vmem:[#allocation2 + $0x30] sm:$0xff] }
 0x14d   :  { %v455_v49 = vmax.f32 %v435_v46, 0.0  ;;  %632 = vmatmul.bf16.vlgmr.msra.gmra.mxu2 %v920_v47 }
 0x14e   :  { %v409_v50 = vpop.f32.mrf.mxu1 }
 0x14f   :  { %v410_v51 = vadd.f32 %v1160_v34, %v409_v50  ;;  %v1009_v52 = vpack.c.bf16 %v455_v49, %v454_v45 }
 0x151   :  { %v445_v54 = vmax.f32 %v410_v51, 0.0  ;;  %1028 = vst [vmem:[#allocation2 + $0x28] sm:$0xff] %v1009_v52  }
 0x152   :  { %v437_v55 = vpop.f32.mrf.mxu3 }
 0x153   :  { %v984_v56 = vpack.c.bf16 %v445_v54, %v444_v53  ;;  %v438_v58 = vadd.f32 %v1160_v34, %v437_v55 }
 0x155   :  { %1023 = vst [vmem:[#allocation2] sm:$0xff] %v984_v56   ;;  %v456_v61 = vmax.f32 %v438_v58, 0.0 }
 0x156   :  { %v412_v57 = vpop.f32.mrf.mxu1 }
 0x157   :  { %v413_v0 = vadd.f32 %v1160_v34, %v412_v57 }
 0x158   :  { %v926_v59 = vld [vmem:[#allocation2 + $0x28] sm:$0xff] }
 0x159   :  { %662 = vmatmul.bf16.vlgmr.msra.gmra.mxu3 %v926_v59  ;;  %v446_v5 = vmax.f32 %v413_v0, 0.0 }
 0x15a   :  { %v439_v60 = vpop.f32.mrf.mxu3 }
 0x15b   :  { %v440_v62 = vadd.f32 %v1160_v34, %v439_v60 }
 0x15c   :  { %v921_v63 = vld [vmem:[#allocation2] sm:$0xff] }
 0x15d   :  { %v457_v1 = vmax.f32 %v440_v62, 0.0  ;;  %637 = vmatmul.bf16.gmra.mxu2 %v921_v63 }
 0x15e   :  { %v414_v2 = vpop.f32.mrf.mxu1 }
 0x15f   :  { %v415_v3 = vadd.f32 %v1160_v34, %v414_v2  ;;  %v1014_v4 = vpack.c.bf16 %v457_v1, %v456_v61 }
 0x161   :  { %v447_v6 = vmax.f32 %v415_v3, 0.0  ;;  %1029 = vst [vmem:[#allocation2 + $0x38] sm:$0xff] %v1014_v4  }
 0x163   :  { %v989_v7 = vpack.c.bf16 %v447_v6, %v446_v5 }
 0x165   :  { %1024 = vst [vmem:[#allocation2 + $0x18] sm:$0xff] %v989_v7  }
 0x166   :  { %v417_v8 = vpop.f32.mrf.mxu1 }
 0x167   :  { %v418_v11 = vadd.f32 %v1160_v34, %v417_v8 }
 0x168   :  { %v927_v9 = vld [vmem:[#allocation2 + $0x38] sm:$0xff] }
 0x169   :  { %667 = vmatmul.bf16.gmra.mxu3 %v927_v9  ;;  %v448_v14 = vmax.f32 %v418_v11, 0.0 }
 0x16c   :  { %v922_v10 = vld [vmem:[#allocation2 + $0x18] sm:$0xff] }
 0x16d   :  { %642 = vmatmul.bf16.gmra.mxu2 %v922_v10 }
 0x16e   :  { %v419_v12 = vpop.f32.mrf.mxu1 }
 0x16f   :  { %v420_v13 = vadd.f32 %v1160_v34, %v419_v12 }
 0x171   :  { %v449_v15 = vmax.f32 %v420_v13, 0.0 }
 0x173   :  { %v994_v16 = vpack.c.bf16 %v449_v15, %v448_v14 }
 0x175   :  { %1025 = vst [vmem:[#allocation2 + $0x10] sm:$0xff] %v994_v16  }
 0x176   :  { %v422_v17 = vpop.f32.mrf.mxu1 }
 0x177   :  { %v423_v19 = vadd.f32 %v1160_v34, %v422_v17 }
 0x179   :  { %v450_v22 = vmax.f32 %v423_v19, 0.0 }
 0x17c   :  { %v923_v18 = vld [vmem:[#allocation2 + $0x10] sm:$0xff] }
 0x17d   :  { %647 = vmatmul.bf16.gmra.mxu2 %v923_v18 }
 0x17e   :  { %v424_v20 = vpop.f32.mrf.mxu1 }
 0x17f   :  { %v425_v21 = vadd.f32 %v1160_v34, %v424_v20 }
 0x181   :  { %v451_v23 = vmax.f32 %v425_v21, 0.0 }
 0x183   :  { %v999_v24 = vpack.c.bf16 %v451_v23, %v450_v22 }
 0x185   :  { %1026 = vst [vmem:[#allocation2 + $0x8] sm:$0xff] %v999_v24  }
 0x186   :  { %v427_v26 = vpop.f32.mrf.mxu1 }
 0x187   :  { %v428_v28 = vadd.f32 %v1160_v34, %v427_v26 }
 0x189   :  { %v452_v31 = vmax.f32 %v428_v28, 0.0 }
 0x18c   :  { %v924_v27 = vld [vmem:[#allocation2 + $0x8] sm:$0xff] }
 0x18d   :  { %652 = vmatmul.bf16.gmra.mxu2 %v924_v27 }
 0x18e   :  { %v429_v29 = vpop.f32.mrf.mxu1 }
 0x18f   :  { %v430_v30 = vadd.f32 %v1160_v34, %v429_v29 }
 0x191   :  { %v453_v32 = vmax.f32 %v430_v30, 0.0 }
 0x193   :  { %v1004_v25 = vpack.c.bf16 %v453_v32, %v452_v31 }
 0x195   :  { %1027 = vst [vmem:[#allocation2 + $0x20] sm:$0xff] %v1004_v25  }
 0x19c   :  { %v925_v33 = vld [vmem:[#allocation2 + $0x20] sm:$0xff] }
 0x19d   :  { %657 = vmatmul.bf16.gmra.mxu2 %v925_v33 }
 0x1d0   :  { %v633_v36 = vpop.f32.mrf.mxu2 }
 0x1d1   :  { %v634_v37 = vadd.f32 %v1059_v35, %v633_v36 }
 0x1d3   :  { %673 = vst [vmem:[%s1232_s3] sm:$0xff] %v634_v37 }
 0x1d8   :  { %v635_v38 = vpop.f32.mrf.mxu2 }
 0x1d9   :  { %v636_v39 = vadd.f32 %v1059_v35, %v635_v38 }
 0x1db   :  { %674 = vst [vmem:[%s1232_s3 + $0x8] sm:$0xff] %v636_v39 }
 0x1dc   :  { %v663_v34 = vpop.f32.mrf.mxu3 }
 0x1dd   :  { %v664_v40 = vadd.f32 %v1059_v35, %v663_v34 }
 0x1df   :  { %685 = vst [vmem:[%s1232_s3 + $0x60] sm:$0xff] %v664_v40 }
 0x1e0   :  { %v638_v41 = vpop.f32.mrf.mxu2 }
 0x1e1   :  { %v639_v42 = vadd.f32 %v1059_v35, %v638_v41 }
 0x1e3   :  { %675 = vst [vmem:[%s1232_s3 + $0x10] sm:$0xff] %v639_v42 }
 0x1e4   :  { %v665_v43 = vpop.f32.mrf.mxu3 }
 0x1e5   :  { %v666_v44 = vadd.f32 %v1059_v35, %v665_v43 }
 0x1e7   :  { %686 = vst [vmem:[%s1232_s3 + $0x68] sm:$0xff] %v666_v44 }
 0x1e8   :  { %v640_v45 = vpop.f32.mrf.mxu2 }
 0x1e9   :  { %v641_v46 = vadd.f32 %v1059_v35, %v640_v45 }
 0x1eb   :  { %676 = vst [vmem:[%s1232_s3 + $0x18] sm:$0xff] %v641_v46 }
 0x1ec   :  { %v668_v47 = vpop.f32.mrf.mxu3 }
 0x1ed   :  { %v669_v48 = vadd.f32 %v1059_v35, %v668_v47 }
 0x1ef   :  { %687 = vst [vmem:[%s1232_s3 + $0x70] sm:$0xff] %v669_v48 }
 0x1f0   :  { %v643_v49 = vpop.f32.mrf.mxu2 }
 0x1f1   :  { %v644_v50 = vadd.f32 %v1059_v35, %v643_v49 }
 0x1f3   :  { %677 = vst [vmem:[%s1232_s3 + $0x20] sm:$0xff] %v644_v50 }
 0x1f4   :  { %v670_v51 = vpop.f32.mrf.mxu3 }
 0x1f5   :  { %v671_v52 = vadd.f32 %v1059_v35, %v670_v51 }
 0x1f7   :  { %688 = vst [vmem:[%s1232_s3 + $0x78] sm:$0xff] %v671_v52 }
 0x1f8   :  { %v645_v53 = vpop.f32.mrf.mxu2 }
 0x1f9   :  { %v646_v54 = vadd.f32 %v1059_v35, %v645_v53 }
 0x1fb   :  { %678 = vst [vmem:[%s1232_s3 + $0x28] sm:$0xff] %v646_v54 }
 0x200   :  { %v648_v55 = vpop.f32.mrf.mxu2 }
 0x201   :  { %v649_v56 = vadd.f32 %v1059_v35, %v648_v55 }
 0x203   :  { %679 = vst [vmem:[%s1232_s3 + $0x30] sm:$0xff] %v649_v56 }
 0x208   :  { %v650_v57 = vpop.f32.mrf.mxu2 }
 0x209   :  { %v651_v58 = vadd.f32 %v1059_v35, %v650_v57 }
 0x20b   :  { %680 = vst [vmem:[%s1232_s3 + $0x38] sm:$0xff] %v651_v58 }
 0x210   :  { %v653_v59 = vpop.f32.mrf.mxu2 }
 0x211   :  { %v654_v60 = vadd.f32 %v1059_v35, %v653_v59 }
 0x213   :  { %681 = vst [vmem:[%s1232_s3 + $0x40] sm:$0xff] %v654_v60 }
 0x218   :  { %v655_v61 = vpop.f32.mrf.mxu2 }
 0x219   :  { %v656_v62 = vadd.f32 %v1059_v35, %v655_v61 }
 0x21b   :  { %682 = vst [vmem:[%s1232_s3 + $0x48] sm:$0xff] %v656_v62 }
 0x220   :  { %v658_v63 = vpop.f32.mrf.mxu2 }
 0x221   :  { %v659_v0 = vadd.f32 %v1059_v35, %v658_v63 }
 0x223   :  { %683 = vst [vmem:[%s1232_s3 + $0x50] sm:$0xff] %v659_v0 }
 0x228   :  { %v660_v1 = vpop.f32.mrf.mxu2 }
 0x229   :  { %v661_v2 = vadd.f32 %v1059_v35, %v660_v1 }
 0x22b   :  { %684 = vst [vmem:[%s1232_s3 + $0x58] sm:$0xff] %v661_v2 }
 0x22c   :  { %693 = vsyncpa [#allocation4], 1 }

</bundles_post_ra>
